<compile_context>
chip_gen: v6e
topology: v6e:2x2x1
jax: 0.10.0
libtpu: 0.0.40
codegen_flags: <defaults>
</compile_context>

<pallas_src>
import jax
import jax.numpy as jnp
from jax import lax
from jax.experimental import pallas as pl
from jax.experimental.pallas import tpu as pltpu

_EPS = 1.0  # faithful to nn.BatchNorm2d(C, True, True): eps <- True == 1.0
_VMEM_LIMIT = 32 * 1024 * 1024  # safe on v5e/v6e (128 MiB) and v7x (64 MiB)


def _stats_kernel(x_ref, sum_ref, sq_ref):
    """Accumulate per-channel sum and sum-of-squares over the (N, HW) grid.

    x_ref:   (TC, THW) native dtype (N dim squeezed by BlockSpec)
    sum_ref: (TC, 1) f32   sq_ref: (TC, 1) f32   (persist across n/t iters)
    """
    first = jnp.logical_and(pl.program_id(1) == 0, pl.program_id(2) == 0)

    @pl.when(first)
    def _():
        sum_ref[...] = jnp.zeros_like(sum_ref)
        sq_ref[...] = jnp.zeros_like(sq_ref)

    x = x_ref[...].astype(jnp.float32)          # single load, reused for both
    sum_ref[...] += jnp.sum(x, axis=-1, keepdims=True)
    sq_ref[...] += jnp.sum(x * x, axis=-1, keepdims=True)


def _normalize_kernel(x_ref, scale_ref, shift_ref, o_ref):
    """y = x * scale[c] + shift[c]   (scale/shift already fold mean/var/eps)."""
    x = x_ref[...].astype(jnp.float32)
    o_ref[...] = (x * scale_ref[...] + shift_ref[...]).astype(o_ref.dtype)


def _pick_hw_tile(hw, tc, itemsize, target_bytes=2 << 20):
    """Largest multiple-of-128 divisor of hw with tc*thw*itemsize <= target."""
    if hw % 128 != 0:
        return hw  # full-extent last dim is always legal
    max_thw = max(128, target_bytes // max(1, tc * itemsize))
    q = hw // 128
    best = 128
    for k in range(1, q + 1):
        if q % k == 0 and 128 * k <= max_thw:
            best = 128 * k
    return best


def freezable_batchnorm2d(x, weight, bias, shadow_weight, shadow_bias, mask,
                          eps=_EPS):
    """Forward pass of _FreezableNormBase('BatchNorm2d', C) in training mode."""
    N, C, H, W = x.shape
    HW = H * W
    L = N * HW

    # Native-layout view: NCHW -> (N, C, HW) is a free contiguous reshape.
    x3 = x.reshape(N, C, HW)

    # Channel tiling: split into two blocks when possible (v7x megacore).
    tc = C // 2 if (C % 32 == 0) else C
    n_c = C // tc
    thw = _pick_hw_tile(HW, tc, x.dtype.itemsize)
    n_t = HW // thw

    x_spec = pl.BlockSpec((None, tc, thw), lambda c, n, t: (n, c, t))
    ch_spec = pl.BlockSpec((tc, 1), lambda c, n, t: (c, 0))

    # ---- pass 1: per-channel sum / sum-of-squares over (N, HW) ----
    ssum, ssq = pl.pallas_call(
        _stats_kernel,
        out_shape=(jax.ShapeDtypeStruct((C, 1), jnp.float32),
                   jax.ShapeDtypeStruct((C, 1), jnp.float32)),
        grid=(n_c, N, n_t),
        in_specs=[x_spec],
        out_specs=(ch_spec, ch_spec),
        compiler_params=pltpu.CompilerParams(
            dimension_semantics=("parallel", "arbitrary", "arbitrary"),
            vmem_limit_bytes=_VMEM_LIMIT),
    )(x3)

    # ---- tiny O(C) work outside the kernels: mix frozen params, fold stats ----
    f32 = jnp.float32
    m = jnp.asarray(mask, f32).reshape(C, 1)
    eff_w = (jnp.asarray(shadow_weight, f32).reshape(C, 1) * m
             + jnp.asarray(weight, f32).reshape(C, 1) * (1.0 - m))
    eff_b = (jnp.asarray(shadow_bias, f32).reshape(C, 1) * m
             + jnp.asarray(bias, f32).reshape(C, 1) * (1.0 - m))
    mean = ssum / L
    var = ssq / L - mean * mean              # biased variance (training-mode BN)
    inv = lax.rsqrt(var + f32(eps))
    scale = eff_w * inv
    shift = eff_b - mean * scale

    # ---- pass 2: normalize (fully parallel, lane-dense output) ----
    out3 = pl.pallas_call(
        _normalize_kernel,
        out_shape=jax.ShapeDtypeStruct((N, C, HW), x.dtype),
        grid=(n_c, N, n_t),
        in_specs=[x_spec, ch_spec, ch_spec],
        out_specs=x_spec,
        compiler_params=pltpu.CompilerParams(
            dimension_semantics=("parallel", "parallel", "parallel"),
            vmem_limit_bytes=_VMEM_LIMIT),
    )(x3, scale, shift)

    return out3.reshape(N, C, H, W)
    # TODO(synk): running_mean / running_var in-place buffer updates (training
    # side effect, momentum==True==1.0) are not modeled; they do not affect the
    # returned tensor.


def _reference(x, weight, bias, shadow_weight, shadow_bias, mask, eps=_EPS):
    """Plain-JAX reference of the same forward semantics."""
    eff_w = shadow_weight * mask + weight * (1.0 - mask)
    eff_b = shadow_bias * mask + bias * (1.0 - mask)
    xf = x.astype(jnp.float32)
    mu = jnp.mean(xf, axis=(0, 2, 3), keepdims=True)
    var = jnp.mean((xf - mu) ** 2, axis=(0, 2, 3), keepdims=True)
    y = (xf - mu) / jnp.sqrt(var + eps)
    return (y * eff_w[None, :, None, None]
            + eff_b[None, :, None, None]).astype(x.dtype)


if __name__ == "__main__":
    key = jax.random.PRNGKey(0)
    kx, kw, kb, ksw, ksb = jax.random.split(key, 5)

    N, C, H, W = 2, 4, 16, 16
    x = jax.random.normal(kx, (N, C, H, W), dtype=jnp.float32)

    # Deterministic synthetic parameters / buffers (shapes follow __init__):
    weight = 1.0 + 0.1 * jax.random.normal(kw, (C,), dtype=jnp.float32)
    bias = 0.1 * jax.random.normal(kb, (C,), dtype=jnp.float32)
    shadow_weight = 1.0 + 0.1 * jax.random.normal(ksw, (C,), dtype=jnp.float32)
    shadow_bias = 0.1 * jax.random.normal(ksb, (C,), dtype=jnp.float32)
    mask = jnp.array([1.0, 0.0, 1.0, 0.0], dtype=jnp.float32)  # ch 0,2 frozen

    out = freezable_batchnorm2d(x, weight, bias, shadow_weight, shadow_bias,
                                mask)
    out = jax.block_until_ready(out)

    ref = _reference(x, weight, bias, shadow_weight, shadow_bias, mask)
    assert out.shape == (N, C, H, W)
    assert out.dtype == x.dtype
    assert jnp.max(jnp.abs(out.astype(jnp.float32) - ref.astype(jnp.float32))) < 1e-4

    print("KERNEL_OK")
</pallas_src>

<mosaic_0001>
module attributes {stable_mosaic.version = 11 : i64} {
  func.func @_stats_kernel(%arg0: i32, %arg1: i32, %arg2: i32, %arg3: memref<1x4x256xf32, #tpu.memory_space<vmem>>, %arg4: memref<4x1xf32, #tpu.memory_space<vmem>>, %arg5: memref<4x1xf32, #tpu.memory_space<vmem>>) attributes {dimension_semantics = [#tpu.dimension_semantics<parallel>, #tpu.dimension_semantics<arbitrary>, #tpu.dimension_semantics<arbitrary>], iteration_bounds = array<i64: 1, 2, 1>, scalar_prefetch = 0 : i64, scratch_operands = 0 : i64, tpu.core_type = #tpu.core_type<tc>, window_params = [{transform_indices = @transform_0, window_bounds = array<i64: 1, 4, 256>}, {transform_indices = @transform_1, window_bounds = array<i64: 4, 1>}, {transform_indices = @transform_2, window_bounds = array<i64: 4, 1>}]} {
    %c0_i32 = arith.constant 0 : i32
    %0 = arith.cmpi eq, %arg1, %c0_i32 : i32
    %c0_i32_0 = arith.constant 0 : i32
    %1 = arith.cmpi eq, %arg2, %c0_i32_0 : i32
    %2 = arith.andi %0, %1 : i1
    %3 = arith.extui %2 : i1 to i32
    %c0_i32_1 = arith.constant 0 : i32
    %4 = arith.cmpi ne, %3, %c0_i32_1 : i32
    scf.if %4 {
      %cst_13 = arith.constant 0.000000e+00 : f32
      %18 = vector.broadcast %cst_13 : f32 to vector<4x1xf32>
      %c0_14 = arith.constant 0 : index
      %c0_15 = arith.constant 0 : index
      %19 = vector.load %arg4[%c0_14, %c0_15] : memref<4x1xf32, #tpu.memory_space<vmem>>, vector<4x1xf32>
      tpu.vector_store %arg4[%c0_14, %c0_15], %18 {strides = array<i32>} : memref<4x1xf32, #tpu.memory_space<vmem>>, vector<4x1xf32>,
      %cst_16 = arith.constant 0.000000e+00 : f32
      %20 = vector.broadcast %cst_16 : f32 to vector<4x1xf32>
      %c0_17 = arith.constant 0 : index
      %c0_18 = arith.constant 0 : index
      %21 = vector.load %arg5[%c0_17, %c0_18] : memref<4x1xf32, #tpu.memory_space<vmem>>, vector<4x1xf32>
      tpu.vector_store %arg5[%c0_17, %c0_18], %20 {strides = array<i32>} : memref<4x1xf32, #tpu.memory_space<vmem>>, vector<4x1xf32>,
    } else {
    }
    %c0 = arith.constant 0 : index
    %c0_2 = arith.constant 0 : index
    %c0_3 = arith.constant 0 : index
    %5 = vector.load %arg3[%c0, %c0_2, %c0_3] : memref<1x4x256xf32, #tpu.memory_space<vmem>>, vector<1x4x256xf32>
    %6 = vector.shape_cast %5 : vector<1x4x256xf32> to vector<4x256xf32>
    %c0_4 = arith.constant 0 : index
    %c0_5 = arith.constant 0 : index
    %7 = vector.load %arg4[%c0_4, %c0_5] : memref<4x1xf32, #tpu.memory_space<vmem>>, vector<4x1xf32>
    %cst = arith.constant dense<0.000000e+00> : vector<4xf32>
    %8 = vector.multi_reduction <add>, %6, %cst [1] : vector<4x256xf32> to vector<4xf32>
    %9 = vector.shape_cast %8 : vector<4xf32> to vector<4x1xf32>
    %10 = arith.addf %7, %9 : vector<4x1xf32>
    %c0_6 = arith.constant 0 : index
    %c0_7 = arith.constant 0 : index
    %11 = vector.load %arg4[%c0_6, %c0_7] : memref<4x1xf32, #tpu.memory_space<vmem>>, vector<4x1xf32>
    tpu.vector_store %arg4[%c0_6, %c0_7], %10 {strides = array<i32>} : memref<4x1xf32, #tpu.memory_space<vmem>>, vector<4x1xf32>,
    %c0_8 = arith.constant 0 : index
    %c0_9 = arith.constant 0 : index
    %12 = vector.load %arg5[%c0_8, %c0_9] : memref<4x1xf32, #tpu.memory_space<vmem>>, vector<4x1xf32>
    %13 = arith.mulf %6, %6 : vector<4x256xf32>
    %cst_10 = arith.constant dense<0.000000e+00> : vector<4xf32>
    %14 = vector.multi_reduction <add>, %13, %cst_10 [1] : vector<4x256xf32> to vector<4xf32>
    %15 = vector.shape_cast %14 : vector<4xf32> to vector<4x1xf32>
    %16 = arith.addf %12, %15 : vector<4x1xf32>
    %c0_11 = arith.constant 0 : index
    %c0_12 = arith.constant 0 : index
    %17 = vector.load %arg5[%c0_11, %c0_12] : memref<4x1xf32, #tpu.memory_space<vmem>>, vector<4x1xf32>
    tpu.vector_store %arg5[%c0_11, %c0_12], %16 {strides = array<i32>} : memref<4x1xf32, #tpu.memory_space<vmem>>, vector<4x1xf32>,
    return
  }
  func.func @transform_0(%arg0: i32, %arg1: i32, %arg2: i32) -> (i32, i32, i32) {
    %c0_i32 = arith.constant 0 : i32
    return %arg1, %arg0, %arg2 : i32, i32, i32
  }
  func.func @transform_1(%arg0: i32, %arg1: i32, %arg2: i32) -> (i32, i32) {
    %c0_i32 = arith.constant 0 : i32
    %c0_i32_0 = arith.constant 0 : i32
    return %arg0, %c0_i32 : i32, i32
  }
  func.func @transform_2(%arg0: i32, %arg1: i32, %arg2: i32) -> (i32, i32) {
    %c0_i32 = arith.constant 0 : i32
    %c0_i32_0 = arith.constant 0 : i32
    return %arg0, %c0_i32 : i32, i32
  }
}

</mosaic_0001>

<bundles_post_ra>
// kernel: tpu_custom_call.1
= control target key start
LH: loop header
LB: loop body
LE: loop exit
PB: predicated region body
PF: predicated region fallthrough
CT: control target
= control target key end

     0   :  { %8 = vsyncpa [#allocation3], 0  ;;  %s623_s0 = inlined_call_operand.hbm [shape: f32[2,4,256], index: 0, kind: input, shape index: {}]   ;;  %s624_s1 = inlined_call_operand.vmem [shape: f32[4,1], index: 1, kind: output, shape index: {0}]   ;;  %s625_s2 = inlined_call_operand.vmem [shape: f32[4,1], index: 2, kind: output, shape index: {1}]  }
   0x1   :  { %10 = vsyncpa [#allocation3 + $0x1], 0  ;;  %s509_s9 = smov 0   ;;  %s511_s10 = smov 0  }
   0x2   :  { %s513_s11 = smov 0   ;;  %s515_s12 = smov 0  }
   0x3   :  { %s517_s13 = smov 0   ;;  %s519_s14 = smov 0  }
   0x4 LB: > { %s340_s15 = sadd.s32 4294967295, %s490_s14   ;;  %s31_s16 = sadd.s32 1, %s486_s13  ;;  %s490_s14 = sphi %s519_s14, %s16_s14   ;;  %s486_s13 = sphi %s517_s13, %s633_s13   ;;  %s482_s12 = sphi %s515_s12, %s632_s12   ;;  %s478_s11 = sphi %s513_s11, %s631_s11   ;;  %s474_s10 = sphi %s511_s10, %s630_s10   ;;  %s470_s9 = sphi %s509_s9, %s629_s9  }
   0x5   : > { %p33_p0 = scmp.ge.s32.totalorder %s31_s16, 2  ;;  %s46_s17 = sadd.s32 1, %s478_s11 }
   0x6   : > { %p53_p1 = scmp.ne.s32.totalorder %s478_s11, %s474_s10  ;;  %p54_p2 = scmp.eq.s32.totalorder %s490_s14, 0 }
   0x7   : > { %s635_s16 = smov (%p33_p0, %s31_s16), 0  ;;  %p59_p4 = scmp.ne.s32.totalorder %s474_s10, %s470_s9 }
   0x8   : > { %p545_p3 = por %p54_p2, %p53_p1  ;;  %s39_s19 = ssub.s32 %s486_s13, %s635_s16 }
   0x9   : > { %p60_p5 = scmp.eq.s32.totalorder %s340_s15, 0  ;;  %p44_p6 = scmp.eq.s32.totalorder %s39_s19, 0 }
   0xa   : > { %p361_p8 = scmp.lt.s32.totalorder %s490_s14, 2  ;;  %s135_s22 = sand.u32 1, %s478_s11  }
   0xb   : > { %p552_p7 = por %p60_p5, %p59_p4  ;;  %s353_s23 = sshll.u32 %s486_s13, 7 }
   0xc   : > { %s558_s21 = scalar_select %p44_p6, %s478_s11, %s46_s17  }
   0xd   : > { %s343_s24 = sshll.u32 %s135_s22, 3  ;;  %s149_s27 = scalar_lea.hbm %s623_s0, %s353_s23 }
   0xe   : > { %s139_s28 = scalar_lea.vmem [#allocation2], %s343_s24  ;;  %p567_p9 = pnand %p361_p8, %p545_p3 }
   0xf   : > { %s151_s29 = sshll.u32 %s139_s28, 4  ;;  %p346_p10 = scmp.ge.s32.totalorder %s490_s14, 1  ;;  %s152_s29 = int_to_ptr.vmem [resolvable:$true] %s151_s29 }
  0x10   : > { %p156_p11 = scmp.lt.s32.totalorder %s490_s14, 3  ;;  %s136_s3 = scalar_lea.sflag [#allocation3], %s135_s22 }
  0x11   : > { %p414_p12 = pneg %p567_p9  ;;  %s425_s4 = scalar_lea.vmem %s152_s29, 128 }
  0x12   : > { %p426_p13 = scmp.ne.s32.totalorder %s152_s29, %s425_s4  ;;  %s492_s5 = smov [#allocation2]  }
  0x13   : > { %s430_s6 = sshll.u32 %s492_s5, 4  ;;  %s431_s6 = int_to_ptr.vmem [resolvable:$false] %s430_s6 }
  0x14   : > { %p428_p0 = pnand %p426_p13, %p414_p12  ;;  %s432_s7 = scalar_lea.vmem %s431_s6, 256 }
  0x15   : > { %p433_p2 = scmp.lt.s32.totalorder %s152_s29, %s431_s6  ;;  %p434_p3 = scmp.lt.s32.totalorder %s432_s7, %s425_s4 }
  0x16   : > { %p429_p1 = pneg %p428_p0 }
  0x17   : > { %p435_p4 = por %p434_p3, %p433_p2 }
  0x19   : > { %p436_p5 = pnand %p435_p4, %p429_p1 }
  0x1b   : > { %439 = shalt.err (!%p436_p5)
}
  0x1c   : > { %360 = dma.hbm_to_vmem [thread:$0]  (!%p567_p9), %s149_s27, 128, %s152_s29, %s136_s3  }
  0x1d   : > { %p157_p6 = pnand %p346_p10, %p156_p11 }
  0x1e   : > { %s162_s8 = sand.u32 (!%p157_p6), 1, %s474_s10  }
  0x1f   : > { %160 = sbr.rel (%p157_p6) target bundleno = 195 (0xc3), region = 24  ;;  %s347_s9 = sshll.u32 (!%p157_p6), %s162_s8, 3 }
  0x20   : > { %s163_s15 = scalar_lea.sflag (!%p157_p6), [#allocation3], %s162_s8  ;;  %s166_s17 = scalar_lea.vmem (!%p157_p6), [#allocation2], %s347_s9 }
  0x24   : > { %465 = dma.done.wait (%p552_p7), %s163_s15, 128  }
  0x25   : > { %467 = vsyncadd (%p552_p7), %s163_s15, 4294967168  ;;  %p199_p8 = scmp.eq.s32.totalorder %s482_s12, 0 }
  0x26   : > { %vm205_vm0 = vcmask (%p199_p8), 3072   ;;  %v493_v0 = vmov (%p199_p8), 0.0  }
  0x27   : > { %204 = sbr.rel (!%p199_p8) target bundleno = 44 (0x2c), region = 32  ;;  %206 = vst.msk [vmem:[%s624_s1] sm:$0xf] (%p199_p8), %vm205_vm0, %v493_v0  ;;  %207 = vst.msk [vmem:[%s625_s2] sm:$0xf] (%p199_p8), %vm205_vm0, %v493_v0 }
  0x2c PF: > { %v208_v1 = vld [vmem:[%s166_s17] sm:$0xff]  ;;  %vm213_vm1 = vcmask 1043456   ;;  %vm220_vm2 = vcmask 3072  }
  0x2d   : > { %v211_v2 = vcombine.high %v208_v1, %v208_v1  ;;  %v214_v3 = vsel %vm213_vm1, %v208_v1, 0.0  ;;  %v223_v4 = vmul.f32 %v208_v1, %v208_v1 }
  0x2e   : > { %v209_v11 = vld [vmem:[%s624_s1] sm:$0xf] }
  0x2f   : > { %v215_v5 = vsel %vm213_vm1, %v211_v2, 0.0  ;;  %v225_v6 = vcombine.high %v223_v4, %v223_v4  ;;  %v227_v7 = vsel %vm213_vm1, %v223_v4, 0.0  ;;  %v222_v14 = vld [vmem:[%s625_s2] sm:$0xf] }
  0x30   : > { %v216_v8 = vadd.f32 %v215_v5, %v214_v3 }
  0x31   : > { %v228_v9 = vsel %vm213_vm1, %v225_v6, 0.0 }
  0x32   : > { %217 = vadd.xlane.f32.xlu0 %v216_v8  ;;  %v229_v10 = vadd.f32 %v228_v9, %v227_v7 }
  0x36   : > { %230 = vadd.xlane.f32.xlu0 %v229_v10 }
  0xbb   : > { %v218_v12 = vpop.xlane.xlu0 %217 }
  0xbc   : > { %v219_v13 = vadd.f32 %v218_v12, %v209_v11 }
  0xbe   : > { %221 = vst.msk [vmem:[%s624_s1] sm:$0xf] %vm220_vm2, %v219_v13 }
  0xbf   : > { %v231_v15 = vpop.xlane.xlu0 %230 }
  0xc0   : > { %v232_v16 = vadd.f32 %v231_v15, %v222_v14 }
  0xc2   : > { %233 = vst.msk [vmem:[%s625_s2] sm:$0xf] %vm220_vm2, %v232_v16 }
  0xc3 PF: > { %s16_s14 = sadd.s32 1, %s490_s14   ;;  %s629_s9 = smov %s474_s10 }
  0xc4   : > { %p13_p7 = scmp.ge.s32.totalorder %s16_s14, 4   ;;  %s630_s10 = smov %s478_s11 }
  0xc5   : > { %s631_s11 = smov %s558_s21  ;;  %s632_s12 = smov %s486_s13 }
  0xc6   : > { %s633_s13 = smov %s635_s16  ;;  %15 = sbr.rel (!%p13_p7) target bundleno = 4 (0x4), region = 80 }
  0xcb   :  { %267 = vsyncpa [#allocation3], 1 }
  0xcc   :  { %269 = vsyncpa [#allocation3 + $0x1], 1 }

</bundles_post_ra>
